<compile_context>
chip_gen: v5e
topology: v5e:2x2
jax: 0.10.0
libtpu: 0.0.40
codegen_flags: <defaults>
</compile_context>

<pallas_src>
import jax
import jax.numpy as jnp
import numpy as np
from jax import lax
from jax.experimental import pallas as pl
from jax.experimental.pallas import tpu as pltpu

# ---- module hyper-parameters (HopfieldPEBALLoss.__init__) ----
NUM_CLASSES      = 8
ENERGY_WEIGHT    = 0.1
HOPFIELD_WEIGHT  = 0.1
PROTOTYPE_WEIGHT = 0.05
ANOMALY_MARGIN   = 10.0
KNOWN_MARGIN     = 1.0
TEMPERATURE      = 0.1
IGNORE_INDEX     = 255
PAD_LABEL        = -1      # lane-pad label: neither valid nor OOD

LANE      = 128            # pixel lane width (vreg lane dim)
TR_MAX    = 128            # max pixel rows per tile (multiple of 8 and 16)
NUM_STATS = 9              # number of accumulated partial-sum planes
P_SPLIT   = 2              # parallel pixel split (uses both v7x TensorCores)


def _make_kernel(C, TR, OUT_R, R, T):
    """Build the stats kernel for static (C, TR, OUT_R, R, T)."""
    fold_groups = TR // OUT_R

    def fold(x):                       # (TR, 128) -> (OUT_R, 128)
        if fold_groups == 1:
            return x
        return jnp.sum(x.reshape(fold_groups, OUT_R, LANE), axis=0)

    def softplus(x):                   # numerically stable, elementwise only
        return jnp.maximum(x, 0.0) + jnp.log1p(jnp.exp(-jnp.abs(x)))

    def kernel(logits_ref, tgt_ref, energy_ref, mem_ref, proto_ref, out_ref):
        # out_ref planes (per (batch, pixel-split); lanes+rows summed outside):
        #  0 sum CE | 1 #valid | 2 #OOD | 3 sum relu(E+km) valid
        #  4 sum relu(am-E) ood | 5 sum mem valid | 6 sum relu(am-mem) ood
        #  7 sum (1-proto)/T valid | 8 sum softplus((1-proto)/T) ood
        t = pl.program_id(2)

        @pl.when(t == 0)
        def _():
            out_ref[...] = jnp.zeros_like(out_ref)

        # Row-range mask: handles the ragged last row-tile (and any
        # fully-out-of-range tile from the parallel pixel split) in-kernel,
        # so logits never need to be padded/copied in HBM.
        block_row = pl.program_id(1) * T + t
        rows = lax.broadcasted_iota(jnp.int32, (TR, LANE), 0)
        in_range = (block_row * TR + rows) < R                    # (TR,128)

        tgt = tgt_ref[...]                                        # int32
        valid = jnp.logical_and(
            jnp.logical_and(tgt != IGNORE_INDEX, tgt >= 0), in_range)
        ood = jnp.logical_and(tgt == IGNORE_INDEX, in_range)

        # ---- cross entropy over the class axis (leading dim, unrolled) ----
        m = logits_ref[0].astype(jnp.float32)
        for c in range(1, C):
            m = jnp.maximum(m, logits_ref[c].astype(jnp.float32))
        ssum = jnp.zeros((TR, LANE), jnp.float32)
        tgt_logit = jnp.zeros((TR, LANE), jnp.float32)
        for c in range(C):
            lc = logits_ref[c].astype(jnp.float32)
            ssum = ssum + jnp.exp(lc - m)
            tgt_logit = jnp.where(tgt == c, lc, tgt_logit)
        lse = jnp.log(ssum) + m

        energy = energy_ref[...].astype(jnp.float32)
        mem    = mem_ref[...].astype(jnp.float32)
        proto  = proto_ref[...].astype(jnp.float32)

        zero = jnp.float32(0.0)
        ce        = jnp.where(valid, lse - tgt_logit, zero)
        known     = jnp.where(valid, jnp.maximum(energy + KNOWN_MARGIN, 0.0), zero)
        unknown   = jnp.where(ood, jnp.maximum(ANOMALY_MARGIN - energy, 0.0), zero)
        mem_in    = jnp.where(valid, mem, zero)
        mem_out   = jnp.where(ood, jnp.maximum(ANOMALY_MARGIN - mem, 0.0), zero)
        psim      = (1.0 - proto) / TEMPERATURE
        proto_in  = jnp.where(valid, psim, zero)
        proto_out = jnp.where(ood, softplus(psim), zero)

        # folded single-vreg-ish read-modify-writes (9 per tile, not 9*TR/8)
        out_ref[0] += fold(ce)
        out_ref[1] += fold(valid.astype(jnp.float32))
        out_ref[2] += fold(ood.astype(jnp.float32))
        out_ref[3] += fold(known)
        out_ref[4] += fold(unknown)
        out_ref[5] += fold(mem_in)
        out_ref[6] += fold(mem_out)
        out_ref[7] += fold(proto_in)
        out_ref[8] += fold(proto_out)

    return kernel


@jax.jit
def hopfield_pebal_loss(logits_nchw, targets_nhw, energy_nhw, mem_nhw, proto_nhw):
    N, C, H, W = logits_nchw.shape
    HW = H * W
    R = pl.cdiv(HW, LANE)
    HW_128 = R * LANE

    logits = logits_nchw.reshape(N, C, HW)           # free reshape (no copy)
    tgt    = targets_nhw.reshape(N, HW).astype(jnp.int32)
    energy = energy_nhw.reshape(N, HW)
    mem    = mem_nhw.reshape(N, HW)
    proto  = proto_nhw.reshape(N, HW)

    if HW_128 != HW:
        # TODO(synk): only when H*W is not a multiple of 128; pads <128 pixels
        # but still copies logits once in HBM (could be an in-kernel lane mask).
        pad = HW_128 - HW
        logits = jnp.pad(logits, ((0, 0), (0, 0), (0, pad)))
        tgt    = jnp.pad(tgt,    ((0, 0), (0, pad)), constant_values=PAD_LABEL)
        energy = jnp.pad(energy, ((0, 0), (0, pad)))
        mem    = jnp.pad(mem,    ((0, 0), (0, pad)))
        proto  = jnp.pad(proto,  ((0, 0), (0, pad)))

    # free metadata-only reshapes to the 2-D pixel layout (rows, 128 lanes)
    logits = logits.reshape(N, C, R, LANE)
    tgt    = tgt.reshape(N, R, LANE)
    energy = energy.reshape(N, R, LANE)
    mem    = mem.reshape(N, R, LANE)
    proto  = proto.reshape(N, R, LANE)

    # row tile: TR_MAX (multiple of 8/16) or the full row extent when R small
    TR = TR_MAX if R >= TR_MAX else R
    OUT_R = 8 if TR % 8 == 0 else TR
    RT = pl.cdiv(R, TR)                  # total row tiles
    P = max(1, min(P_SPLIT, RT))         # parallel pixel split (v7x)
    T = pl.cdiv(RT, P)                   # sequential tiles per (n, p)

    kernel = _make_kernel(C, TR, OUT_R, R, T)

    stats = pl.pallas_call(
        kernel,
        out_shape=jax.ShapeDtypeStruct((N, P, NUM_STATS, OUT_R, LANE), jnp.float32),
        grid_spec=pltpu.PrefetchScalarGridSpec(
            num_scalar_prefetch=0,
            grid=(N, P, T),
            in_specs=[
                pl.BlockSpec((None, C, TR, LANE), lambda n, p, t: (n, 0, p * T + t, 0)),
                pl.BlockSpec((None, TR, LANE),    lambda n, p, t: (n, p * T + t, 0)),
                pl.BlockSpec((None, TR, LANE),    lambda n, p, t: (n, p * T + t, 0)),
                pl.BlockSpec((None, TR, LANE),    lambda n, p, t: (n, p * T + t, 0)),
                pl.BlockSpec((None, TR, LANE),    lambda n, p, t: (n, p * T + t, 0)),
            ],
            out_specs=pl.BlockSpec((None, None, NUM_STATS, OUT_R, LANE),
                                   lambda n, p, t: (n, p, 0, 0, 0)),
        ),
        compiler_params=pltpu.CompilerParams(
            dimension_semantics=("parallel", "parallel", "arbitrary")),
    )(logits, tgt, energy, mem, proto)

    s = jnp.sum(stats, axis=(0, 1, 3, 4))          # (NUM_STATS,)
    s_ce, n_valid, n_ood = s[0], s[1], s[2]
    s_known, s_unknown   = s[3], s[4]
    s_mem_in, s_mem_out  = s[5], s[6]
    s_pin, s_pout        = s[7], s[8]

    def safe_mean(total, count):
        # NOTE: PyTorch yields NaN for an empty-selection mean; we return 0.
        return jnp.where(count > 0, total / jnp.maximum(count, 1.0), 0.0)

    seg_loss      = safe_mean(s_ce, n_valid)
    energy_loss   = safe_mean(s_known, n_valid) + safe_mean(s_unknown, n_ood)
    hopfield_loss = safe_mean(s_mem_in, n_valid) + safe_mean(s_mem_out, n_ood)
    # TODO(synk): the random 1000-element subsampling (torch.randperm) in
    # _prototype_loss is omitted; values differ from the reference whenever a
    # batch has >1000 valid or OOD pixels.
    proto_loss = jnp.where(
        jnp.logical_and(n_valid > 0, n_ood > 0),
        -safe_mean(s_pin, n_valid) + safe_mean(s_pout, n_ood),
        0.0)

    total = (seg_loss
             + ENERGY_WEIGHT * energy_loss
             + HOPFIELD_WEIGHT * hopfield_loss
             + PROTOTYPE_WEIGHT * proto_loss)

    return {
        "seg_loss": seg_loss,
        "energy_loss": energy_loss,
        "hopfield_loss": hopfield_loss,
        "proto_loss": proto_loss,
        "loss": total,
    }


def _reference_loss(logits, targets, energy, mem, proto):
    """Plain-JAX reference mirroring the PyTorch forward (same conventions)."""
    N, C, H, W = logits.shape
    lg = jnp.transpose(logits, (0, 2, 3, 1)).reshape(-1, C).astype(jnp.float32)
    tg = targets.reshape(-1)
    en = energy.reshape(-1).astype(jnp.float32)
    me = mem.reshape(-1).astype(jnp.float32)
    pr = proto.reshape(-1).astype(jnp.float32)

    valid = tg != IGNORE_INDEX
    ood = tg == IGNORE_INDEX
    nv = valid.sum().astype(jnp.float32)
    no = ood.sum().astype(jnp.float32)

    def sm(total, count):
        return jnp.where(count > 0, total / jnp.maximum(count, 1.0), 0.0)

    lse = jax.scipy.special.logsumexp(lg, axis=-1)
    tl = jnp.take_along_axis(lg, jnp.clip(tg, 0, C - 1)[:, None], axis=-1)[:, 0]
    seg = sm(jnp.where(valid, lse - tl, 0.0).sum(), nv)

    e_loss = (sm(jnp.where(valid, jnp.maximum(en + KNOWN_MARGIN, 0.0), 0.0).sum(), nv)
              + sm(jnp.where(ood, jnp.maximum(ANOMALY_MARGIN - en, 0.0), 0.0).sum(), no))
    h_loss = (sm(jnp.where(valid, me, 0.0).sum(), nv)
              + sm(jnp.where(ood, jnp.maximum(ANOMALY_MARGIN - me, 0.0), 0.0).sum(), no))
    psim = (1.0 - pr) / TEMPERATURE
    p_loss = jnp.where(
        jnp.logical_and(nv > 0, no > 0),
        -sm(jnp.where(valid, psim, 0.0).sum(), nv)
        + sm(jnp.where(ood, jax.nn.softplus(psim), 0.0).sum(), no),
        0.0)
    total = seg + ENERGY_WEIGHT * e_loss + HOPFIELD_WEIGHT * h_loss + PROTOTYPE_WEIGHT * p_loss
    return {"seg_loss": seg, "energy_loss": e_loss, "hopfield_loss": h_loss,
            "proto_loss": p_loss, "loss": total}


if __name__ == "__main__":
    key = jax.random.PRNGKey(0)
    kl, kt, km, ke, kme, kp = jax.random.split(key, 6)

    N, C, H, W = 2, NUM_CLASSES, 16, 16

    logits = jax.random.normal(kl, (N, C, H, W), dtype=jnp.float32)
    targets = jax.random.randint(kt, (N, H, W), 0, C, dtype=jnp.int32)
    # mark ~15% of pixels as ignore/OOD (label 255)
    ood_mask = jax.random.uniform(km, (N, H, W)) < 0.15
    targets = jnp.where(ood_mask, jnp.int32(IGNORE_INDEX), targets)

    energy             = jax.random.normal(ke, (N, H, W), dtype=jnp.float32) * 3.0
    memory_energies    = jax.random.normal(kme, (N, H, W), dtype=jnp.float32) * 2.0 + 1.0
    prototype_energies = jax.random.uniform(kp, (N, H, W), dtype=jnp.float32)

    out = hopfield_pebal_loss(logits, targets, energy, memory_energies,
                              prototype_energies)
    out = jax.tree_util.tree_map(jax.block_until_ready, out)

    ref = _reference_loss(logits, targets, energy, memory_energies,
                          prototype_energies)
    for k in out:
        np.testing.assert_allclose(np.asarray(out[k]), np.asarray(ref[k]),
                                   rtol=2e-4, atol=1e-5)
    print("KERNEL_OK")
</pallas_src>

<mosaic_0001>
module attributes {stable_mosaic.version = 11 : i64} {
  func.func @kernel(%arg0: i32, %arg1: i32, %arg2: i32, %arg3: memref<1x8x2x128xf32, #tpu.memory_space<vmem>>, %arg4: memref<1x2x128xi32, #tpu.memory_space<vmem>>, %arg5: memref<1x2x128xf32, #tpu.memory_space<vmem>>, %arg6: memref<1x2x128xf32, #tpu.memory_space<vmem>>, %arg7: memref<1x2x128xf32, #tpu.memory_space<vmem>>, %arg8: memref<1x1x9x2x128xf32, #tpu.memory_space<vmem>>) attributes {dimension_semantics = [#tpu.dimension_semantics<parallel>, #tpu.dimension_semantics<parallel>, #tpu.dimension_semantics<arbitrary>], iteration_bounds = array<i64: 2, 1, 1>, scalar_prefetch = 0 : i64, scratch_operands = 0 : i64, tpu.core_type = #tpu.core_type<tc>, window_params = [{transform_indices = @transform_0, window_bounds = array<i64: 1, 8, 2, 128>}, {transform_indices = @transform_1, window_bounds = array<i64: 1, 2, 128>}, {transform_indices = @transform_2, window_bounds = array<i64: 1, 2, 128>}, {transform_indices = @transform_3, window_bounds = array<i64: 1, 2, 128>}, {transform_indices = @transform_4, window_bounds = array<i64: 1, 2, 128>}, {transform_indices = @transform_5, window_bounds = array<i64: 1, 1, 9, 2, 128>}]} {
    %c0_i32 = arith.constant 0 : i32
    %0 = arith.cmpi eq, %arg2, %c0_i32 : i32
    %1 = arith.extui %0 : i1 to i32
    %c0_i32_0 = arith.constant 0 : i32
    %2 = arith.cmpi ne, %1, %c0_i32_0 : i32
    scf.if %2 {
      %cst_182 = arith.constant 0.000000e+00 : f32
      %216 = vector.broadcast %cst_182 : f32 to vector<9x2x128xf32>
      %c0_183 = arith.constant 0 : index
      %c0_184 = arith.constant 0 : index
      %c0_185 = arith.constant 0 : index
      %c0_186 = arith.constant 0 : index
      %c0_187 = arith.constant 0 : index
      %217 = vector.load %arg8[%c0_183, %c0_184, %c0_185, %c0_186, %c0_187] : memref<1x1x9x2x128xf32, #tpu.memory_space<vmem>>, vector<1x1x9x2x128xf32>
      %218 = vector.shape_cast %217 : vector<1x1x9x2x128xf32> to vector<9x2x128xf32>
      %219 = vector.shape_cast %216 : vector<9x2x128xf32> to vector<1x1x9x2x128xf32>
      tpu.vector_store %arg8[%c0_183, %c0_184, %c0_185, %c0_186, %c0_187], %219 {strides = array<i32>} : memref<1x1x9x2x128xf32, #tpu.memory_space<vmem>>, vector<1x1x9x2x128xf32>,
    } else {
    }
    %c1_i32 = arith.constant 1 : i32
    %3 = arith.muli %arg1, %c1_i32 : i32
    %4 = arith.addi %3, %arg2 : i32
    %5 = tpu.iota {dimensions = array<i32: 0>} : vector<2x128xi32>
    %c2_i32 = arith.constant 2 : i32
    %6 = arith.muli %4, %c2_i32 : i32
    %7 = vector.broadcast %6 : i32 to vector<2x128xi32>
    %8 = arith.addi %7, %5 : vector<2x128xi32>
    %c2_i32_1 = arith.constant 2 : i32
    %9 = vector.broadcast %c2_i32_1 : i32 to vector<2x128xi32>
    %10 = arith.cmpi slt, %8, %9 : vector<2x128xi32>
    %c0 = arith.constant 0 : index
    %c0_2 = arith.constant 0 : index
    %c0_3 = arith.constant 0 : index
    %11 = vector.load %arg4[%c0, %c0_2, %c0_3] : memref<1x2x128xi32, #tpu.memory_space<vmem>>, vector<1x2x128xi32>
    %12 = vector.shape_cast %11 : vector<1x2x128xi32> to vector<2x128xi32>
    %c255_i32 = arith.constant 255 : i32
    %13 = vector.broadcast %c255_i32 : i32 to vector<2x128xi32>
    %14 = arith.cmpi ne, %12, %13 : vector<2x128xi32>
    %c0_i32_4 = arith.constant 0 : i32
    %15 = vector.broadcast %c0_i32_4 : i32 to vector<2x128xi32>
    %16 = arith.cmpi sge, %12, %15 : vector<2x128xi32>
    %17 = arith.andi %14, %16 : vector<2x128xi1>
    %18 = arith.andi %17, %10 : vector<2x128xi1>
    %c255_i32_5 = arith.constant 255 : i32
    %19 = vector.broadcast %c255_i32_5 : i32 to vector<2x128xi32>
    %20 = arith.cmpi eq, %12, %19 : vector<2x128xi32>
    %21 = arith.andi %20, %10 : vector<2x128xi1>
    %c0_6 = arith.constant 0 : index
    %c0_7 = arith.constant 0 : index
    %c0_8 = arith.constant 0 : index
    %c0_9 = arith.constant 0 : index
    %22 = vector.load %arg3[%c0_6, %c0_7, %c0_8, %c0_9] : memref<1x8x2x128xf32, #tpu.memory_space<vmem>>, vector<1x1x2x128xf32>
    %23 = vector.shape_cast %22 : vector<1x1x2x128xf32> to vector<2x128xf32>
    %c0_10 = arith.constant 0 : index
    %c1 = arith.constant 1 : index
    %c0_11 = arith.constant 0 : index
    %c0_12 = arith.constant 0 : index
    %24 = vector.load %arg3[%c0_10, %c1, %c0_11, %c0_12] : memref<1x8x2x128xf32, #tpu.memory_space<vmem>>, vector<1x1x2x128xf32>
    %25 = vector.shape_cast %24 : vector<1x1x2x128xf32> to vector<2x128xf32>
    %26 = arith.maximumf %23, %25 : vector<2x128xf32>
    %c0_13 = arith.constant 0 : index
    %c2 = arith.constant 2 : index
    %c0_14 = arith.constant 0 : index
    %c0_15 = arith.constant 0 : index
    %27 = vector.load %arg3[%c0_13, %c2, %c0_14, %c0_15] : memref<1x8x2x128xf32, #tpu.memory_space<vmem>>, vector<1x1x2x128xf32>
    %28 = vector.shape_cast %27 : vector<1x1x2x128xf32> to vector<2x128xf32>
    %29 = arith.maximumf %26, %28 : vector<2x128xf32>
    %c0_16 = arith.constant 0 : index
    %c3 = arith.constant 3 : index
    %c0_17 = arith.constant 0 : index
    %c0_18 = arith.constant 0 : index
    %30 = vector.load %arg3[%c0_16, %c3, %c0_17, %c0_18] : memref<1x8x2x128xf32, #tpu.memory_space<vmem>>, vector<1x1x2x128xf32>
    %31 = vector.shape_cast %30 : vector<1x1x2x128xf32> to vector<2x128xf32>
    %32 = arith.maximumf %29, %31 : vector<2x128xf32>
    %c0_19 = arith.constant 0 : index
    %c4 = arith.constant 4 : index
    %c0_20 = arith.constant 0 : index
    %c0_21 = arith.constant 0 : index
    %33 = vector.load %arg3[%c0_19, %c4, %c0_20, %c0_21] : memref<1x8x2x128xf32, #tpu.memory_space<vmem>>, vector<1x1x2x128xf32>
    %34 = vector.shape_cast %33 : vector<1x1x2x128xf32> to vector<2x128xf32>
    %35 = arith.maximumf %32, %34 : vector<2x128xf32>
    %c0_22 = arith.constant 0 : index
    %c5 = arith.constant 5 : index
    %c0_23 = arith.constant 0 : index
    %c0_24 = arith.constant 0 : index
    %36 = vector.load %arg3[%c0_22, %c5, %c0_23, %c0_24] : memref<1x8x2x128xf32, #tpu.memory_space<vmem>>, vector<1x1x2x128xf32>
    %37 = vector.shape_cast %36 : vector<1x1x2x128xf32> to vector<2x128xf32>
    %38 = arith.maximumf %35, %37 : vector<2x128xf32>
    %c0_25 = arith.constant 0 : index
    %c6 = arith.constant 6 : index
    %c0_26 = arith.constant 0 : index
    %c0_27 = arith.constant 0 : index
    %39 = vector.load %arg3[%c0_25, %c6, %c0_26, %c0_27] : memref<1x8x2x128xf32, #tpu.memory_space<vmem>>, vector<1x1x2x128xf32>
    %40 = vector.shape_cast %39 : vector<1x1x2x128xf32> to vector<2x128xf32>
    %41 = arith.maximumf %38, %40 : vector<2x128xf32>
    %c0_28 = arith.constant 0 : index
    %c7 = arith.constant 7 : index
    %c0_29 = arith.constant 0 : index
    %c0_30 = arith.constant 0 : index
    %42 = vector.load %arg3[%c0_28, %c7, %c0_29, %c0_30] : memref<1x8x2x128xf32, #tpu.memory_space<vmem>>, vector<1x1x2x128xf32>
    %43 = vector.shape_cast %42 : vector<1x1x2x128xf32> to vector<2x128xf32>
    %44 = arith.maximumf %41, %43 : vector<2x128xf32>
    %cst = arith.constant 0.000000e+00 : f32
    %45 = vector.broadcast %cst : f32 to vector<2x128xf32>
    %cst_31 = arith.constant 0.000000e+00 : f32
    %46 = vector.broadcast %cst_31 : f32 to vector<2x128xf32>
    %c0_32 = arith.constant 0 : index
    %c0_33 = arith.constant 0 : index
    %c0_34 = arith.constant 0 : index
    %c0_35 = arith.constant 0 : index
    %47 = vector.load %arg3[%c0_32, %c0_33, %c0_34, %c0_35] : memref<1x8x2x128xf32, #tpu.memory_space<vmem>>, vector<1x1x2x128xf32>
    %48 = vector.shape_cast %47 : vector<1x1x2x128xf32> to vector<2x128xf32>
    %49 = arith.subf %48, %44 : vector<2x128xf32>
    %50 = math.exp %49 : vector<2x128xf32>
    %51 = arith.addf %45, %50 : vector<2x128xf32>
    %c0_i32_36 = arith.constant 0 : i32
    %52 = vector.broadcast %c0_i32_36 : i32 to vector<2x128xi32>
    %53 = arith.cmpi eq, %12, %52 : vector<2x128xi32>
    %54 = arith.select %53, %48, %46 : vector<2x128xi1>, vector<2x128xf32>
    %c0_37 = arith.constant 0 : index
    %c1_38 = arith.constant 1 : index
    %c0_39 = arith.constant 0 : index
    %c0_40 = arith.constant 0 : index
    %55 = vector.load %arg3[%c0_37, %c1_38, %c0_39, %c0_40] : memref<1x8x2x128xf32, #tpu.memory_space<vmem>>, vector<1x1x2x128xf32>
    %56 = vector.shape_cast %55 : vector<1x1x2x128xf32> to vector<2x128xf32>
    %57 = arith.subf %56, %44 : vector<2x128xf32>
    %58 = math.exp %57 : vector<2x128xf32>
    %59 = arith.addf %51, %58 : vector<2x128xf32>
    %c1_i32_41 = arith.constant 1 : i32
    %60 = vector.broadcast %c1_i32_41 : i32 to vector<2x128xi32>
    %61 = arith.cmpi eq, %12, %60 : vector<2x128xi32>
    %62 = arith.select %61, %56, %54 : vector<2x128xi1>, vector<2x128xf32>
    %c0_42 = arith.constant 0 : index
    %c2_43 = arith.constant 2 : index
    %c0_44 = arith.constant 0 : index
    %c0_45 = arith.constant 0 : index
    %63 = vector.load %arg3[%c0_42, %c2_43, %c0_44, %c0_45] : memref<1x8x2x128xf32, #tpu.memory_space<vmem>>, vector<1x1x2x128xf32>
    %64 = vector.shape_cast %63 : vector<1x1x2x128xf32> to vector<2x128xf32>
    %65 = arith.subf %64, %44 : vector<2x128xf32>
    %66 = math.exp %65 : vector<2x128xf32>
    %67 = arith.addf %59, %66 : vector<2x128xf32>
    %c2_i32_46 = arith.constant 2 : i32
    %68 = vector.broadcast %c2_i32_46 : i32 to vector<2x128xi32>
    %69 = arith.cmpi eq, %12, %68 : vector<2x128xi32>
    %70 = arith.select %69, %64, %62 : vector<2x128xi1>, vector<2x128xf32>
    %c0_47 = arith.constant 0 : index
    %c3_48 = arith.constant 3 : index
    %c0_49 = arith.constant 0 : index
    %c0_50 = arith.constant 0 : index
    %71 = vector.load %arg3[%c0_47, %c3_48, %c0_49, %c0_50] : memref<1x8x2x128xf32, #tpu.memory_space<vmem>>, vector<1x1x2x128xf32>
    %72 = vector.shape_cast %71 : vector<1x1x2x128xf32> to vector<2x128xf32>
    %73 = arith.subf %72, %44 : vector<2x128xf32>
    %74 = math.exp %73 : vector<2x128xf32>
    %75 = arith.addf %67, %74 : vector<2x128xf32>
    %c3_i32 = arith.constant 3 : i32
    %76 = vector.broadcast %c3_i32 : i32 to vector<2x128xi32>
    %77 = arith.cmpi eq, %12, %76 : vector<2x128xi32>
    %78 = arith.select %77, %72, %70 : vector<2x128xi1>, vector<2x128xf32>
    %c0_51 = arith.constant 0 : index
    %c4_52 = arith.constant 4 : index
    %c0_53 = arith.constant 0 : index
    %c0_54 = arith.constant 0 : index
    %79 = vector.load %arg3[%c0_51, %c4_52, %c0_53, %c0_54] : memref<1x8x2x128xf32, #tpu.memory_space<vmem>>, vector<1x1x2x128xf32>
    %80 = vector.shape_cast %79 : vector<1x1x2x128xf32> to vector<2x128xf32>
    %81 = arith.subf %80, %44 : vector<2x128xf32>
    %82 = math.exp %81 : vector<2x128xf32>
    %83 = arith.addf %75, %82 : vector<2x128xf32>
    %c4_i32 = arith.constant 4 : i32
    %84 = vector.broadcast %c4_i32 : i32 to vector<2x128xi32>
    %85 = arith.cmpi eq, %12, %84 : vector<2x128xi32>
    %86 = arith.select %85, %80, %78 : vector<2x128xi1>, vector<2x128xf32>
    %c0_55 = arith.constant 0 : index
    %c5_56 = arith.constant 5 : index
    %c0_57 = arith.constant 0 : index
    %c0_58 = arith.constant 0 : index
    %87 = vector.load %arg3[%c0_55, %c5_56, %c0_57, %c0_58] : memref<1x8x2x128xf32, #tpu.memory_space<vmem>>, vector<1x1x2x128xf32>
    %88 = vector.shape_cast %87 : vector<1x1x2x128xf32> to vector<2x128xf32>
    %89 = arith.subf %88, %44 : vector<2x128xf32>
    %90 = math.exp %89 : vector<2x128xf32>
    %91 = arith.addf %83, %90 : vector<2x128xf32>
    %c5_i32 = arith.constant 5 : i32
    %92 = vector.broadcast %c5_i32 : i32 to vector<2x128xi32>
    %93 = arith.cmpi eq, %12, %92 : vector<2x128xi32>
    %94 = arith.select %93, %88, %86 : vector<2x128xi1>, vector<2x128xf32>
    %c0_59 = arith.constant 0 : index
    %c6_60 = arith.constant 6 : index
    %c0_61 = arith.constant 0 : index
    %c0_62 = arith.constant 0 : index
    %95 = vector.load %arg3[%c0_59, %c6_60, %c0_61, %c0_62] : memref<1x8x2x128xf32, #tpu.memory_space<vmem>>, vector<1x1x2x128xf32>
    %96 = vector.shape_cast %95 : vector<1x1x2x128xf32> to vector<2x128xf32>
    %97 = arith.subf %96, %44 : vector<2x128xf32>
    %98 = math.exp %97 : vector<2x128xf32>
    %99 = arith.addf %91, %98 : vector<2x128xf32>
    %c6_i32 = arith.constant 6 : i32
    %100 = vector.broadcast %c6_i32 : i32 to vector<2x128xi32>
    %101 = arith.cmpi eq, %12, %100 : vector<2x128xi32>
    %102 = arith.select %101, %96, %94 : vector<2x128xi1>, vector<2x128xf32>
    %c0_63 = arith.constant 0 : index
    %c7_64 = arith.constant 7 : index
    %c0_65 = arith.constant 0 : index
    %c0_66 = arith.constant 0 : index
    %103 = vector.load %arg3[%c0_63, %c7_64, %c0_65, %c0_66] : memref<1x8x2x128xf32, #tpu.memory_space<vmem>>, vector<1x1x2x128xf32>
    %104 = vector.shape_cast %103 : vector<1x1x2x128xf32> to vector<2x128xf32>
    %105 = arith.subf %104, %44 : vector<2x128xf32>
    %106 = math.exp %105 : vector<2x128xf32>
    %107 = arith.addf %99, %106 : vector<2x128xf32>
    %c7_i32 = arith.constant 7 : i32
    %108 = vector.broadcast %c7_i32 : i32 to vector<2x128xi32>
    %109 = arith.cmpi eq, %12, %108 : vector<2x128xi32>
    %110 = arith.select %109, %104, %102 : vector<2x128xi1>, vector<2x128xf32>
    %111 = math.log %107 : vector<2x128xf32>
    %112 = arith.addf %111, %44 : vector<2x128xf32>
    %c0_67 = arith.constant 0 : index
    %c0_68 = arith.constant 0 : index
    %c0_69 = arith.constant 0 : index
    %113 = vector.load %arg5[%c0_67, %c0_68, %c0_69] : memref<1x2x128xf32, #tpu.memory_space<vmem>>, vector<1x2x128xf32>
    %114 = vector.shape_cast %113 : vector<1x2x128xf32> to vector<2x128xf32>
    %c0_70 = arith.constant 0 : index
    %c0_71 = arith.constant 0 : index
    %c0_72 = arith.constant 0 : index
    %115 = vector.load %arg6[%c0_70, %c0_71, %c0_72] : memref<1x2x128xf32, #tpu.memory_space<vmem>>, vector<1x2x128xf32>
    %116 = vector.shape_cast %115 : vector<1x2x128xf32> to vector<2x128xf32>
    %c0_73 = arith.constant 0 : index
    %c0_74 = arith.constant 0 : index
    %c0_75 = arith.constant 0 : index
    %117 = vector.load %arg7[%c0_73, %c0_74, %c0_75] : memref<1x2x128xf32, #tpu.memory_space<vmem>>, vector<1x2x128xf32>
    %118 = vector.shape_cast %117 : vector<1x2x128xf32> to vector<2x128xf32>
    %119 = arith.subf %112, %110 : vector<2x128xf32>
    %cst_76 = arith.constant 0.000000e+00 : f32
    %120 = vector.broadcast %cst_76 : f32 to vector<2x128xf32>
    %121 = arith.select %18, %119, %120 : vector<2x128xi1>, vector<2x128xf32>
    %cst_77 = arith.constant 1.000000e+00 : f32
    %122 = vector.broadcast %cst_77 : f32 to vector<2x128xf32>
    %123 = arith.addf %114, %122 : vector<2x128xf32>
    %cst_78 = arith.constant 0.000000e+00 : f32
    %124 = vector.broadcast %cst_78 : f32 to vector<2x128xf32>
    %125 = arith.maximumf %123, %124 : vector<2x128xf32>
    %cst_79 = arith.constant 0.000000e+00 : f32
    %126 = vector.broadcast %cst_79 : f32 to vector<2x128xf32>
    %127 = arith.select %18, %125, %126 : vector<2x128xi1>, vector<2x128xf32>
    %cst_80 = arith.constant 1.000000e+01 : f32
    %128 = vector.broadcast %cst_80 : f32 to vector<2x128xf32>
    %129 = arith.subf %128, %114 : vector<2x128xf32>
    %cst_81 = arith.constant 0.000000e+00 : f32
    %130 = vector.broadcast %cst_81 : f32 to vector<2x128xf32>
    %131 = arith.maximumf %129, %130 : vector<2x128xf32>
    %cst_82 = arith.constant 0.000000e+00 : f32
    %132 = vector.broadcast %cst_82 : f32 to vector<2x128xf32>
    %133 = arith.select %21, %131, %132 : vector<2x128xi1>, vector<2x128xf32>
    %cst_83 = arith.constant 0.000000e+00 : f32
    %134 = vector.broadcast %cst_83 : f32 to vector<2x128xf32>
    %135 = arith.select %18, %116, %134 : vector<2x128xi1>, vector<2x128xf32>
    %cst_84 = arith.constant 1.000000e+01 : f32
    %136 = vector.broadcast %cst_84 : f32 to vector<2x128xf32>
    %137 = arith.subf %136, %116 : vector<2x128xf32>
    %cst_85 = arith.constant 0.000000e+00 : f32
    %138 = vector.broadcast %cst_85 : f32 to vector<2x128xf32>
    %139 = arith.maximumf %137, %138 : vector<2x128xf32>
    %cst_86 = arith.constant 0.000000e+00 : f32
    %140 = vector.broadcast %cst_86 : f32 to vector<2x128xf32>
    %141 = arith.select %21, %139, %140 : vector<2x128xi1>, vector<2x128xf32>
    %cst_87 = arith.constant 1.000000e+00 : f32
    %142 = vector.broadcast %cst_87 : f32 to vector<2x128xf32>
    %143 = arith.subf %142, %118 : vector<2x128xf32>
    %cst_88 = arith.constant 1.000000e-01 : f32
    %144 = vector.broadcast %cst_88 : f32 to vector<2x128xf32>
    %145 = arith.divf %143, %144 : vector<2x128xf32>
    %cst_89 = arith.constant 0.000000e+00 : f32
    %146 = vector.broadcast %cst_89 : f32 to vector<2x128xf32>
    %147 = arith.select %18, %145, %146 : vector<2x128xi1>, vector<2x128xf32>
    %cst_90 = arith.constant 0.000000e+00 : f32
    %148 = vector.broadcast %cst_90 : f32 to vector<2x128xf32>
    %149 = arith.maximumf %145, %148 : vector<2x128xf32>
    %150 = math.absf %145 : vector<2x128xf32>
    %cst_91 = arith.constant 0.000000e+00 : f32
    %151 = vector.broadcast %cst_91 : f32 to vector<2x128xf32>
    %152 = arith.subf %151, %150 : vector<2x128xf32>
    %153 = math.exp %152 : vector<2x128xf32>
    %154 = math.log1p %153 : vector<2x128xf32>
    %155 = arith.addf %149, %154 : vector<2x128xf32>
    %cst_92 = arith.constant 0.000000e+00 : f32
    %156 = vector.broadcast %cst_92 : f32 to vector<2x128xf32>
    %157 = arith.select %21, %155, %156 : vector<2x128xi1>, vector<2x128xf32>
    %c0_93 = arith.constant 0 : index
    %c0_94 = arith.constant 0 : index
    %c0_95 = arith.constant 0 : index
    %c0_96 = arith.constant 0 : index
    %c0_97 = arith.constant 0 : index
    %158 = vector.load %arg8[%c0_93, %c0_94, %c0_95, %c0_96, %c0_97] : memref<1x1x9x2x128xf32, #tpu.memory_space<vmem>>, vector<1x1x1x2x128xf32>
    %159 = vector.shape_cast %158 : vector<1x1x1x2x128xf32> to vector<2x128xf32>
    %160 = arith.addf %159, %121 : vector<2x128xf32>
    %c0_98 = arith.constant 0 : index
    %c0_99 = arith.constant 0 : index
    %c0_100 = arith.constant 0 : index
    %c0_101 = arith.constant 0 : index
    %c0_102 = arith.constant 0 : index
    %161 = vector.load %arg8[%c0_98, %c0_99, %c0_100, %c0_101, %c0_102] : memref<1x1x9x2x128xf32, #tpu.memory_space<vmem>>, vector<1x1x1x2x128xf32>
    %162 = vector.shape_cast %161 : vector<1x1x1x2x128xf32> to vector<2x128xf32>
    %163 = vector.shape_cast %160 : vector<2x128xf32> to vector<1x1x1x2x128xf32>
    tpu.vector_store %arg8[%c0_98, %c0_99, %c0_100, %c0_101, %c0_102], %163 {strides = array<i32>} : memref<1x1x9x2x128xf32, #tpu.memory_space<vmem>>, vector<1x1x1x2x128xf32>,
    %c0_103 = arith.constant 0 : index
    %c0_104 = arith.constant 0 : index
    %c1_105 = arith.constant 1 : index
    %c0_106 = arith.constant 0 : index
    %c0_107 = arith.constant 0 : index
    %164 = vector.load %arg8[%c0_103, %c0_104, %c1_105, %c0_106, %c0_107] : memref<1x1x9x2x128xf32, #tpu.memory_space<vmem>>, vector<1x1x1x2x128xf32>
    %165 = vector.shape_cast %164 : vector<1x1x1x2x128xf32> to vector<2x128xf32>
    %166 = arith.extui %18 : vector<2x128xi1> to vector<2x128xi32>
    %167 = arith.sitofp %166 : vector<2x128xi32> to vector<2x128xf32>
    %168 = arith.addf %165, %167 : vector<2x128xf32>
    %c0_108 = arith.constant 0 : index
    %c0_109 = arith.constant 0 : index
    %c1_110 = arith.constant 1 : index
    %c0_111 = arith.constant 0 : index
    %c0_112 = arith.constant 0 : index
    %169 = vector.load %arg8[%c0_108, %c0_109, %c1_110, %c0_111, %c0_112] : memref<1x1x9x2x128xf32, #tpu.memory_space<vmem>>, vector<1x1x1x2x128xf32>
    %170 = vector.shape_cast %169 : vector<1x1x1x2x128xf32> to vector<2x128xf32>
    %171 = vector.shape_cast %168 : vector<2x128xf32> to vector<1x1x1x2x128xf32>
    tpu.vector_store %arg8[%c0_108, %c0_109, %c1_110, %c0_111, %c0_112], %171 {strides = array<i32>} : memref<1x1x9x2x128xf32, #tpu.memory_space<vmem>>, vector<1x1x1x2x128xf32>,
    %c0_113 = arith.constant 0 : index
    %c0_114 = arith.constant 0 : index
    %c2_115 = arith.constant 2 : index
    %c0_116 = arith.constant 0 : index
    %c0_117 = arith.constant 0 : index
    %172 = vector.load %arg8[%c0_113, %c0_114, %c2_115, %c0_116, %c0_117] : memref<1x1x9x2x128xf32, #tpu.memory_space<vmem>>, vector<1x1x1x2x128xf32>
    %173 = vector.shape_cast %172 : vector<1x1x1x2x128xf32> to vector<2x128xf32>
    %174 = arith.extui %21 : vector<2x128xi1> to vector<2x128xi32>
    %175 = arith.sitofp %174 : vector<2x128xi32> to vector<2x128xf32>
    %176 = arith.addf %173, %175 : vector<2x128xf32>
    %c0_118 = arith.constant 0 : index
    %c0_119 = arith.constant 0 : index
    %c2_120 = arith.constant 2 : index
    %c0_121 = arith.constant 0 : index
    %c0_122 = arith.constant 0 : index
    %177 = vector.load %arg8[%c0_118, %c0_119, %c2_120, %c0_121, %c0_122] : memref<1x1x9x2x128xf32, #tpu.memory_space<vmem>>, vector<1x1x1x2x128xf32>
    %178 = vector.shape_cast %177 : vector<1x1x1x2x128xf32> to vector<2x128xf32>
    %179 = vector.shape_cast %176 : vector<2x128xf32> to vector<1x1x1x2x128xf32>
    tpu.vector_store %arg8[%c0_118, %c0_119, %c2_120, %c0_121, %c0_122], %179 {strides = array<i32>} : memref<1x1x9x2x128xf32, #tpu.memory_space<vmem>>, vector<1x1x1x2x128xf32>,
    %c0_123 = arith.constant 0 : index
    %c0_124 = arith.constant 0 : index
    %c3_125 = arith.constant 3 : index
    %c0_126 = arith.constant 0 : index
    %c0_127 = arith.constant 0 : index
    %180 = vector.load %arg8[%c0_123, %c0_124, %c3_125, %c0_126, %c0_127] : memref<1x1x9x2x128xf32, #tpu.memory_space<vmem>>, vector<1x1x1x2x128xf32>
    %181 = vector.shape_cast %180 : vector<1x1x1x2x128xf32> to vector<2x128xf32>
    %182 = arith.addf %181, %127 : vector<2x128xf32>
    %c0_128 = arith.constant 0 : index
    %c0_129 = arith.constant 0 : index
    %c3_130 = arith.constant 3 : index
    %c0_131 = arith.constant 0 : index
    %c0_132 = arith.constant 0 : index
    %183 = vector.load %arg8[%c0_128, %c0_129, %c3_130, %c0_131, %c0_132] : memref<1x1x9x2x128xf32, #tpu.memory_space<vmem>>, vector<1x1x1x2x128xf32>
    %184 = vector.shape_cast %183 : vector<1x1x1x2x128xf32> to vector<2x128xf32>
    %185 = vector.shape_cast %182 : vector<2x128xf32> to vector<1x1x1x2x128xf32>
    tpu.vector_store %arg8[%c0_128, %c0_129, %c3_130, %c0_131, %c0_132], %185 {strides = array<i32>} : memref<1x1x9x2x128xf32, #tpu.memory_space<vmem>>, vector<1x1x1x2x128xf32>,
    %c0_133 = arith.constant 0 : index
    %c0_134 = arith.constant 0 : index
    %c4_135 = arith.constant 4 : index
    %c0_136 = arith.constant 0 : index
    %c0_137 = arith.constant 0 : index
    %186 = vector.load %arg8[%c0_133, %c0_134, %c4_135, %c0_136, %c0_137] : memref<1x1x9x2x128xf32, #tpu.memory_space<vmem>>, vector<1x1x1x2x128xf32>
    %187 = vector.shape_cast %186 : vector<1x1x1x2x128xf32> to vector<2x128xf32>
    %188 = arith.addf %187, %133 : vector<2x128xf32>
    %c0_138 = arith.constant 0 : index
    %c0_139 = arith.constant 0 : index
    %c4_140 = arith.constant 4 : index
    %c0_141 = arith.constant 0 : index
    %c0_142 = arith.constant 0 : index
    %189 = vector.load %arg8[%c0_138, %c0_139, %c4_140, %c0_141, %c0_142] : memref<1x1x9x2x128xf32, #tpu.memory_space<vmem>>, vector<1x1x1x2x128xf32>
    %190 = vector.shape_cast %189 : vector<1x1x1x2x128xf32> to vector<2x128xf32>
    %191 = vector.shape_cast %188 : vector<2x128xf32> to vector<1x1x1x2x128xf32>
    tpu.vector_store %arg8[%c0_138, %c0_139, %c4_140, %c0_141, %c0_142], %191 {strides = array<i32>} : memref<1x1x9x2x128xf32, #tpu.memory_space<vmem>>, vector<1x1x1x2x128xf32>,
    %c0_143 = arith.constant 0 : index
    %c0_144 = arith.constant 0 : index
    %c5_145 = arith.constant 5 : index
    %c0_146 = arith.constant 0 : index
    %c0_147 = arith.constant 0 : index
    %192 = vector.load %arg8[%c0_143, %c0_144, %c5_145, %c0_146, %c0_147] : memref<1x1x9x2x128xf32, #tpu.memory_space<vmem>>, vector<1x1x1x2x128xf32>
    %193 = vector.shape_cast %192 : vector<1x1x1x2x128xf32> to vector<2x128xf32>
    %194 = arith.addf %193, %135 : vector<2x128xf32>
    %c0_148 = arith.constant 0 : index
    %c0_149 = arith.constant 0 : index
    %c5_150 = arith.constant 5 : index
    %c0_151 = arith.constant 0 : index
    %c0_152 = arith.constant 0 : index
    %195 = vector.load %arg8[%c0_148, %c0_149, %c5_150, %c0_151, %c0_152] : memref<1x1x9x2x128xf32, #tpu.memory_space<vmem>>, vector<1x1x1x2x128xf32>
    %196 = vector.shape_cast %195 : vector<1x1x1x2x128xf32> to vector<2x128xf32>
    %197 = vector.shape_cast %194 : vector<2x128xf32> to vector<1x1x1x2x128xf32>
    tpu.vector_store %arg8[%c0_148, %c0_149, %c5_150, %c0_151, %c0_152], %197 {strides = array<i32>} : memref<1x1x9x2x128xf32, #tpu.memory_space<vmem>>, vector<1x1x1x2x128xf32>,
    %c0_153 = arith.constant 0 : index
    %c0_154 = arith.constant 0 : index
    %c6_155 = arith.constant 6 : index
    %c0_156 = arith.constant 0 : index
    %c0_157 = arith.constant 0 : index
    %198 = vector.load %arg8[%c0_153, %c0_154, %c6_155, %c0_156, %c0_157] : memref<1x1x9x2x128xf32, #tpu.memory_space<vmem>>, vector<1x1x1x2x128xf32>
    %199 = vector.shape_cast %198 : vector<1x1x1x2x128xf32> to vector<2x128xf32>
    %200 = arith.addf %199, %141 : vector<2x128xf32>
    %c0_158 = arith.constant 0 : index
    %c0_159 = arith.constant 0 : index
    %c6_160 = arith.constant 6 : index
    %c0_161 = arith.constant 0 : index
    %c0_162 = arith.constant 0 : index
    %201 = vector.load %arg8[%c0_158, %c0_159, %c6_160, %c0_161, %c0_162] : memref<1x1x9x2x128xf32, #tpu.memory_space<vmem>>, vector<1x1x1x2x128xf32>
    %202 = vector.shape_cast %201 : vector<1x1x1x2x128xf32> to vector<2x128xf32>
    %203 = vector.shape_cast %200 : vector<2x128xf32> to vector<1x1x1x2x128xf32>
    tpu.vector_store %arg8[%c0_158, %c0_159, %c6_160, %c0_161, %c0_162], %203 {strides = array<i32>} : memref<1x1x9x2x128xf32, #tpu.memory_space<vmem>>, vector<1x1x1x2x128xf32>,
    %c0_163 = arith.constant 0 : index
    %c0_164 = arith.constant 0 : index
    %c7_165 = arith.constant 7 : index
    %c0_166 = arith.constant 0 : index
    %c0_167 = arith.constant 0 : index
    %204 = vector.load %arg8[%c0_163, %c0_164, %c7_165, %c0_166, %c0_167] : memref<1x1x9x2x128xf32, #tpu.memory_space<vmem>>, vector<1x1x1x2x128xf32>
    %205 = vector.shape_cast %204 : vector<1x1x1x2x128xf32> to vector<2x128xf32>
    %206 = arith.addf %205, %147 : vector<2x128xf32>
    %c0_168 = arith.constant 0 : index
    %c0_169 = arith.constant 0 : index
    %c7_170 = arith.constant 7 : index
    %c0_171 = arith.constant 0 : index
    %c0_172 = arith.constant 0 : index
    %207 = vector.load %arg8[%c0_168, %c0_169, %c7_170, %c0_171, %c0_172] : memref<1x1x9x2x128xf32, #tpu.memory_space<vmem>>, vector<1x1x1x2x128xf32>
    %208 = vector.shape_cast %207 : vector<1x1x1x2x128xf32> to vector<2x128xf32>
    %209 = vector.shape_cast %206 : vector<2x128xf32> to vector<1x1x1x2x128xf32>
    tpu.vector_store %arg8[%c0_168, %c0_169, %c7_170, %c0_171, %c0_172], %209 {strides = array<i32>} : memref<1x1x9x2x128xf32, #tpu.memory_space<vmem>>, vector<1x1x1x2x128xf32>,
    %c0_173 = arith.constant 0 : index
    %c0_174 = arith.constant 0 : index
    %c8 = arith.constant 8 : index
    %c0_175 = arith.constant 0 : index
    %c0_176 = arith.constant 0 : index
    %210 = vector.load %arg8[%c0_173, %c0_174, %c8, %c0_175, %c0_176] : memref<1x1x9x2x128xf32, #tpu.memory_space<vmem>>, vector<1x1x1x2x128xf32>
    %211 = vector.shape_cast %210 : vector<1x1x1x2x128xf32> to vector<2x128xf32>
    %212 = arith.addf %211, %157 : vector<2x128xf32>
    %c0_177 = arith.constant 0 : index
    %c0_178 = arith.constant 0 : index
    %c8_179 = arith.constant 8 : index
    %c0_180 = arith.constant 0 : index
    %c0_181 = arith.constant 0 : index
    %213 = vector.load %arg8[%c0_177, %c0_178, %c8_179, %c0_180, %c0_181] : memref<1x1x9x2x128xf32, #tpu.memory_space<vmem>>, vector<1x1x1x2x128xf32>
    %214 = vector.shape_cast %213 : vector<1x1x1x2x128xf32> to vector<2x128xf32>
    %215 = vector.shape_cast %212 : vector<2x128xf32> to vector<1x1x1x2x128xf32>
    tpu.vector_store %arg8[%c0_177, %c0_178, %c8_179, %c0_180, %c0_181], %215 {strides = array<i32>} : memref<1x1x9x2x128xf32, #tpu.memory_space<vmem>>, vector<1x1x1x2x128xf32>,
    return
  }
  func.func @transform_0(%arg0: i32, %arg1: i32, %arg2: i32) -> (i32, i32, i32, i32) {
    %c1_i32 = arith.constant 1 : i32
    %0 = arith.muli %arg1, %c1_i32 : i32
    %1 = arith.addi %0, %arg2 : i32
    %c0_i32 = arith.constant 0 : i32
    %c0_i32_0 = arith.constant 0 : i32
    %c0_i32_1 = arith.constant 0 : i32
    return %arg0, %c0_i32, %1, %c0_i32_0 : i32, i32, i32, i32
  }
  func.func @transform_1(%arg0: i32, %arg1: i32, %arg2: i32) -> (i32, i32, i32) {
    %c1_i32 = arith.constant 1 : i32
    %0 = arith.muli %arg1, %c1_i32 : i32
    %1 = arith.addi %0, %arg2 : i32
    %c0_i32 = arith.constant 0 : i32
    %c0_i32_0 = arith.constant 0 : i32
    return %arg0, %1, %c0_i32 : i32, i32, i32
  }
  func.func @transform_2(%arg0: i32, %arg1: i32, %arg2: i32) -> (i32, i32, i32) {
    %c1_i32 = arith.constant 1 : i32
    %0 = arith.muli %arg1, %c1_i32 : i32
    %1 = arith.addi %0, %arg2 : i32
    %c0_i32 = arith.constant 0 : i32
    %c0_i32_0 = arith.constant 0 : i32
    return %arg0, %1, %c0_i32 : i32, i32, i32
  }
  func.func @transform_3(%arg0: i32, %arg1: i32, %arg2: i32) -> (i32, i32, i32) {
    %c1_i32 = arith.constant 1 : i32
    %0 = arith.muli %arg1, %c1_i32 : i32
    %1 = arith.addi %0, %arg2 : i32
    %c0_i32 = arith.constant 0 : i32
    %c0_i32_0 = arith.constant 0 : i32
    return %arg0, %1, %c0_i32 : i32, i32, i32
  }
  func.func @transform_4(%arg0: i32, %arg1: i32, %arg2: i32) -> (i32, i32, i32) {
    %c1_i32 = arith.constant 1 : i32
    %0 = arith.muli %arg1, %c1_i32 : i32
    %1 = arith.addi %0, %arg2 : i32
    %c0_i32 = arith.constant 0 : i32
    %c0_i32_0 = arith.constant 0 : i32
    return %arg0, %1, %c0_i32 : i32, i32, i32
  }
  func.func @transform_5(%arg0: i32, %arg1: i32, %arg2: i32) -> (i32, i32, i32, i32, i32) {
    %c0_i32 = arith.constant 0 : i32
    %c0_i32_0 = arith.constant 0 : i32
    %c0_i32_1 = arith.constant 0 : i32
    %c0_i32_2 = arith.constant 0 : i32
    return %arg0, %arg1, %c0_i32, %c0_i32_0, %c0_i32_1 : i32, i32, i32, i32, i32
  }
}

</mosaic_0001>

<bundles_post_ra>
// kernel: hopfield_pebal_loss.1
= control target key start
LH: loop header
LB: loop body
LE: loop exit
PB: predicated region body
PF: predicated region fallthrough
CT: control target
= control target key end

     0   :  { %s891_s18 = smov 0   ;;  %s893_s19 = smov 0   ;;  %s1091_s0 = inlined_call_operand.vmem [shape: f32[2,8,2,128], index: 0, kind: input, shape index: {}]   ;;  %s1092_s1 = inlined_call_operand.vmem [shape: s32[2,2,128], index: 1, kind: input, shape index: {}]   ;;  %s1093_s2 = inlined_call_operand.vmem [shape: f32[2,2,128], index: 2, kind: input, shape index: {}]   ;;  %s1094_s3 = inlined_call_operand.vmem [shape: f32[2,2,128], index: 3, kind: input, shape index: {}]   ;;  %s1095_s4 = inlined_call_operand.vmem [shape: f32[2,2,128], index: 4, kind: input, shape index: {}]   ;;  %s1096_s5 = inlined_call_operand.vmem [shape: f32[2,1,9,2,128], index: 5, kind: output, shape index: {}]  }
   0x1   :  { %s895_s20 = smov 0  }
   0x2 LB: > { %s34_s21 = sadd.s32 1, %s853_s19  ;;  %p748_p0 = scmp.ge.s32.totalorder %s857_s20, 1  ;;  %s857_s20 = sphi %s895_s20, %s15_s20   ;;  %s853_s19 = sphi %s893_s19, %s1102_s19   ;;  %s849_s18 = sphi %s891_s18, %s1101_s18  }
   0x3   : > { %p36_p1 = scmp.ge.s32.totalorder %s34_s21, 2  ;;  %p289_p2 = scmp.lt.s32.totalorder %s857_s20, 3 }
   0x5   : > { %s1104_s21 = smov (%p36_p1, %s34_s21), 0  ;;  %p290_p3 = pnand %p748_p0, %p289_p2 }
   0x6   : > { %p358_p4 = scmp.lt.s32.totalorder (!%p290_p3), %s849_s18, 1 }
   0x7   : > { %293 = sbr.rel (%p290_p3) target bundleno = 73 (0x49), region = 40 }
   0xc   : > { %s1106_s18 = smov (!%p358_p4, %s849_s18), 1  ;;  %v859_v0 = vmov 0.1   ;;  %v860_v4 = vmov 0.0   ;;  %v426_v11 = vlaneseq }
   0xd   : > { %s784_s22 = smul.u32 18, %s1106_s18  ;;  %s783_s23 = sshll.u32 %s1106_s18, 4  ;;  %811 = vrcp.f32 %v859_v0 }
   0xe   : > { %s912_s26 = scalar_lea.vmem %s1091_s0, %s783_s23  ;;  %s947_s30 = sshll.u32 %s1106_s18, 1  ;;  %v427_v17 = vshrl.u32 %v426_v11, 7 }
   0xf   : > { %s917_s29 = scalar_lea.vmem %s1096_s5, %s784_s22  ;;  %v920_v1 = vld [vmem:[%s912_s26] sm:$0x3]  ;;  %v923_v2 = vld [vmem:[%s912_s26 + $0x2] sm:$0x3]  ;;  %v926_v3 = vld [vmem:[%s912_s26 + $0x4] sm:$0x3]  ;;  %s401_s8 = scalar_lea.vmem %s1095_s4, %s947_s30 }
  0x10   : > { %416 = vst [vmem:[%s917_s29] sm:$0x3] %v860_v4  ;;  %v442_v5 = vmax.f32 %v920_v1, %v923_v2  ;;  %v935_v6 = vld [vmem:[%s912_s26 + $0x6] sm:$0x3]  ;;  %v943_v8 = vld [vmem:[%s912_s26 + $0x8] sm:$0x3]  ;;  %s374_s11 = scalar_lea.vmem %s1092_s1, %s947_s30  ;;  %vm431_vm2 = vcmp.lt.s32.totalorder %v427_v17, 2  ;;  %s383_s14 = scalar_lea.vmem %s1093_s2, %s947_s30 }
  0x11   : > { %417 = vst [vmem:[%s917_s29 + $0x2] sm:$0x3] %v860_v4  ;;  %v953_v12 = vld [vmem:[%s912_s26 + $0xa] sm:$0x3]  ;;  %v961_v14 = vld [vmem:[%s912_s26 + $0xc] sm:$0x3]  ;;  %s392_s17 = scalar_lea.vmem %s1094_s3, %s947_s30 }
  0x12   : > { %418 = vst [vmem:[%s917_s29 + $0x4] sm:$0x3] %v860_v4  ;;  %v445_v7 = vmax.f32 %v442_v5, %v926_v3  ;;  %v975_v18 = vld [vmem:[%s912_s26 + $0xe] sm:$0x3]  ;;  %v514_v21 = vld [vmem:[%s401_s8] sm:$0x3] }
  0x13   : > { %419 = vst [vmem:[%s917_s29 + $0x6] sm:$0x3] %v860_v4  ;;  %v812_v9 = vpop.eup %811  ;;  %v978_v22 = vld [vmem:[%s374_s11] sm:$0x3]  ;;  %v527_v25 = vsub.f32 1.0, %v514_v21 }
  0x14   : > { %420 = vst [vmem:[%s917_s29 + $0x8] sm:$0x3] %v860_v4  ;;  %v448_v10 = vmax.f32 %v445_v7, %v935_v6  ;;  %v529_v15 = vmul.f32 0.1, %v812_v9  ;;  %vm433_vm0 = vcmp.ne.s32.totalorder %v978_v22, 255  ;;  %vm434_vm1 = vcmp.ge.s32.totalorder %v978_v22, 0 }
  0x15   : > { %421 = vst [vmem:[%s917_s29 + $0xa] sm:$0x3] %v860_v4  ;;  %vm533_vm3 = vweird.f32 %v812_v9  ;;  %vm435_vm4 = vmand %vm433_vm0, %vm434_vm1  ;;  %vm465_vm5 = vcmp.eq.s32.totalorder %v978_v22, 0  ;;  %v512_v44 = vld [vmem:[%s383_s14] sm:$0x3]  ;;  %vm437_vm7 = vcmp.eq.s32.totalorder %v978_v22, 255 }
  0x16   : > { %422 = vst [vmem:[%s917_s29 + $0xc] sm:$0x3] %v860_v4  ;;  %v451_v13 = vmax.f32 %v448_v10, %v943_v8  ;;  %v530_v19 = vsub.f32 1.0, %v529_v15  ;;  %vm1013_vm6 = vmand %vm435_vm4, %vm431_vm2  ;;  %v517_v45 = vadd.f32 1.0, %v512_v44  ;;  %v520_v46 = vsub.f32 10.0, %v512_v44 }
  0x17   : > { %423 = vst [vmem:[%s917_s29 + $0xe] sm:$0x3] %v860_v4  ;;  %v513_v47 = vld [vmem:[%s392_s17] sm:$0x3]  ;;  %vm1019_vm8 = vmand %vm437_vm7, %vm431_vm2  ;;  %v764_v53 = vsel %vm1013_vm6, 1.0, %v860_v4  ;;  %vm471_vm9 = vcmp.eq.s32.totalorder %v978_v22, 1 }
  0x18   : > { %424 = vst [vmem:[%s917_s29 + $0x10] sm:$0x3] %v860_v4  ;;  %v454_v16 = vmax.f32 %v451_v13, %v953_v12  ;;  %v531_v23 = vmul.f32 %v812_v9, %v530_v19  ;;  %v524_v51 = vsub.f32 10.0, %v513_v47  ;;  %v763_v52 = vld [vmem:[%s917_s29 + $0x2] sm:$0x3]  ;;  %v767_v54 = vsel %vm1019_vm8, 1.0, %v860_v4 }
  0x19   : > { %v560_v56 = vadd.f32 %v764_v53, %v763_v52  ;;  %v766_v57 = vld [vmem:[%s917_s29 + $0x4] sm:$0x3]  ;;  %v518_v58 = vmax.f32 %v517_v45, 0.0  ;;  %v521_v60 = vmax.f32 %v520_v46, 0.0  ;;  %v523_v63 = vsel %vm1013_vm6, %v513_v47, 0.0 }
  0x1a   : > { %v457_v20 = vmax.f32 %v454_v16, %v961_v14  ;;  %v532_v26 = vadd.f32 %v812_v9, %v531_v23  ;;  %v769_v59 = vld [vmem:[%s917_s29 + $0x6] sm:$0x3]  ;;  %v566_v61 = vadd.f32 %v767_v54, %v766_v57  ;;  %v525_v5 = vmax.f32 %v524_v51, 0.0 }
  0x1b   : > { %v771_v62 = vld [vmem:[%s917_s29 + $0x8] sm:$0x3]  ;;  %765 = vst [vmem:[%s917_s29 + $0x2] sm:$0x3] %v560_v56  ;;  %v519_v7 = vsel %vm1013_vm6, %v518_v58, 0.0  ;;  %vm477_vm10 = vcmp.eq.s32.totalorder %v978_v22, 2 }
  0x1c   : > { %v983_v24 = vmax.f32 %v457_v20, %v975_v18  ;;  %v534_v38 = vsel %vm533_vm3, %v812_v9, %v532_v26  ;;  %v773_v0 = vld [vmem:[%s917_s29 + $0xa] sm:$0x3]  ;;  %v522_v9 = vsel %vm1019_vm8, %v521_v60, 0.0  ;;  %768 = vst [vmem:[%s917_s29 + $0x4] sm:$0x3] %v566_v61  ;;  %v570_v15 = vadd.f32 %v769_v59, %v519_v7 }
  0x1d   : > { %v1010_v40 = vmul.f32 %v534_v38, %v527_v25  ;;  %v578_v10 = vadd.f32 %v773_v0, %v523_v63  ;;  %v775_v11 = vld [vmem:[%s917_s29 + $0xc] sm:$0x3]  ;;  %v574_v16 = vadd.f32 %v771_v62, %v522_v9  ;;  %v526_v17 = vsel %vm1019_vm8, %v525_v5, 0.0  ;;  %v553_v61 = vld [vmem:[%s917_s29] sm:$0x3] }
  0x1e   : > { %v461_v27 = vsub.f32 %v920_v1, %v983_v24  ;;  %v467_v28 = vsub.f32 %v923_v2, %v983_v24  ;;  %v473_v29 = vsub.f32 %v926_v3, %v983_v24  ;;  %v479_v30 = vsub.f32 %v935_v6, %v983_v24  ;;  %v777_v19 = vld [vmem:[%s917_s29 + $0xe] sm:$0x3]  ;;  %770 = vst [vmem:[%s917_s29 + $0x6] sm:$0x3] %v570_v15 }
  0x1f   : > { %v485_v31 = vsub.f32 %v943_v8, %v983_v24  ;;  %v491_v32 = vsub.f32 %v953_v12, %v983_v24  ;;  %v497_v33 = vsub.f32 %v961_v14, %v983_v24  ;;  %v503_v34 = vsub.f32 %v975_v18, %v983_v24  ;;  %774 = vst [vmem:[%s917_s29 + $0xa] sm:$0x3] %v578_v10  ;;  %v779_v59 = vld [vmem:[%s917_s29 + $0x10] sm:$0x3] }
  0x20   : > { %v462_v35 = vmul.f32 1.442695, %v461_v27  ;;  %v468_v36 = vmul.f32 1.442695, %v467_v28  ;;  %v474_v37 = vmul.f32 1.442695, %v473_v29  ;;  %v582_v23 = vadd.f32 %v775_v11, %v526_v17 }
  0x21   : > { %v480_v39 = vmul.f32 1.442695, %v479_v30  ;;  %v486_v42 = vmul.f32 1.442695, %v485_v31  ;;  %v492_v43 = vmul.f32 1.442695, %v491_v32 }
  0x22   : > { %813 = vpow2.f32 %v462_v35  ;;  %v498_v48 = vmul.f32 1.442695, %v497_v33  ;;  %v504_v49 = vmul.f32 1.442695, %v503_v34  ;;  %v538_v55 = vand.u32 2147483647, %v1010_v40 }
  0x23   : > { %815 = vpow2.f32 %v468_v36  ;;  %v536_v25 = vsel %vm1013_vm6, %v1010_v40, 0.0  ;;  %v466_v28 = vsel %vm465_vm5, %v920_v1, 0.0  ;;  %772 = vst [vmem:[%s917_s29 + $0x8] sm:$0x3] %v574_v16  ;;  %vm483_vm11 = vcmp.eq.s32.totalorder %v978_v22, 3 }
  0x24   : > { %817 = vpow2.f32 %v474_v37  ;;  %v539_v26 = vsub.f32 0.0, %v538_v55  ;;  %v586_v29 = vadd.f32 %v777_v19, %v536_v25  ;;  %776 = vst [vmem:[%s917_s29 + $0xc] sm:$0x3] %v582_v23  ;;  %v472_v33 = vsel %vm471_vm9, %v923_v2, %v466_v28 }
  0x25   : > { %819 = vpow2.f32 %v480_v39  ;;  %v478_v37 = vsel %vm477_vm10, %v926_v3, %v472_v33  ;;  %vm489_vm12 = vcmp.eq.s32.totalorder %v978_v22, 4  ;;  %vm495_vm13 = vcmp.eq.s32.totalorder %v978_v22, 5 }
  0x26   : > { %821 = vpow2.f32 %v486_v42  ;;  %v540_v31 = vmul.f32 1.442695, %v539_v26  ;;  %778 = vst [vmem:[%s917_s29 + $0xe] sm:$0x3] %v586_v29  ;;  %vm501_vm14 = vcmp.eq.s32.totalorder %v978_v22, 6  ;;  %vm507_vm15 = vcmp.eq.s32.totalorder %v978_v22, 7 }
  0x27   : > { %823 = vpow2.f32 %v492_v43  ;;  %v484_v43 = vsel %vm483_vm11, %v935_v6, %v478_v37 }
  0x28   : > { %v814_v4 = vpop.eup %813  ;;  %825 = vpow2.f32 %v498_v48  ;;  %v490_v47 = vsel %vm489_vm12, %v943_v8, %v484_v43  ;;  %v537_v8 = vmax.f32 %v1010_v40, 0.0 }
  0x29   : > { %v816_v13 = vpop.eup %815  ;;  %827 = vpow2.f32 %v504_v49  ;;  %v496_v49 = vsel %vm495_vm13, %v953_v12, %v490_v47 }
  0x2a   : > { %v818_v20 = vpop.eup %817  ;;  %v470_v21 = vadd.f32 %v816_v13, %v814_v4  ;;  %829 = vpow2.f32 %v540_v31  ;;  %v502_v52 = vsel %vm501_vm14, %v961_v14, %v496_v49 }
  0x2b   : > { %v820_v27 = vpop.eup %819  ;;  %v508_v56 = vsel %vm507_vm15, %v975_v18, %v502_v52 }
  0x2c   : > { %v476_v30 = vadd.f32 %v818_v20, %v470_v21  ;;  %v822_v32 = vpop.eup %821 }
  0x2d   : > { %v824_v35 = vpop.eup %823 }
  0x2e   : > { %v482_v34 = vadd.f32 %v820_v27, %v476_v30  ;;  %v826_v36 = vpop.eup %825 }
  0x2f   : > { %v828_v39 = vpop.eup %827 }
  0x30   : > { %v488_v1 = vadd.f32 %v822_v32, %v482_v34  ;;  %v830_v42 = vpop.eup %829 }
  0x31   : > { %v542_v44 = vadd.f32 1.0, %v830_v42  ;;  %v545_v45 = vmul.f32 -0.5, %v830_v42  ;;  %v548_v48 = vand.u32 2147483647, %v830_v42 }
  0x32   : > { %v494_v38 = vadd.f32 %v824_v35, %v488_v1 }
  0x33   : > { %831 = vlog2.f32 %v542_v44  ;;  %v546_v3 = vadd.f32 1.0, %v545_v45  ;;  %vm549_vm0 = vcmp.lt.f32.partialorder %v548_v48, 0.0004427343 }
  0x34   : > { %v500_v2 = vadd.f32 %v826_v36, %v494_v38 }
  0x35   : > { %v547_v6 = vmul.f32 %v830_v42, %v546_v3 }
  0x36   : > { %v506_v46 = vadd.f32 %v828_v39, %v500_v2 }
  0x38   : > { %833 = vlog2.f32 %v506_v46 }
  0x39   : > { %v832_v51 = vpop.eup %831 }
  0x3a   : > { %v544_v54 = vmul.f32 0.6931472, %v832_v51 }
  0x3c   : > { %v550_v12 = vsel %vm549_vm0, %v547_v6, %v544_v54 }
  0x3d   : > { %v551_v58 = vadd.f32 %v550_v12, %v537_v8 }
  0x3e   : > { %v834_v53 = vpop.eup %833 }
  0x3f   : > { %v510_v55 = vmul.f32 0.6931472, %v834_v53  ;;  %v552_v14 = vsel %vm1019_vm8, %v551_v58, 0.0 }
  0x40   : > { %v590_v22 = vadd.f32 %v779_v59, %v552_v14 }
  0x41   : > { %v511_v57 = vadd.f32 %v510_v55, %v983_v24 }
  0x42   : > { %780 = vst [vmem:[%s917_s29 + $0x10] sm:$0x3] %v590_v22 }
  0x43   : > { %v515_v60 = vsub.f32 %v511_v57, %v508_v56 }
  0x45   : > { %v516_v40 = vsel %vm1013_vm6, %v515_v60, 0.0 }
  0x46   : > { %v554_v62 = vadd.f32 %v553_v61, %v516_v40 }
  0x48   : > { %555 = vst [vmem:[%s917_s29] sm:$0x3] %v554_v62 }
  0x49 PF: > { %s15_s20 = sadd.s32 1, %s857_s20   ;;  %s1101_s18 = smov %s853_s19 }
  0x4a   : > { %p12_p5 = scmp.ge.s32.totalorder %s15_s20, 4   ;;  %s1102_s19 = smov %s1104_s21 }
  0x4c   :  { %14 = sbr.rel (!%p12_p5) target bundleno = 2 (0x2), region = 101 }

</bundles_post_ra>
